<compile_context>
chip_gen: v7x
topology: tpu7x:2x2x1
jax: 0.10.0
libtpu: 0.0.40
codegen_flags: <defaults>
</compile_context>

<pallas_src>
import jax
import jax.numpy as jnp
from jax.experimental import pallas as pl
from jax.experimental.pallas import tpu as pltpu

EMBEDDED_SIZE = 16  # default of the PyTorch module


def _encoder_kernel(v_ref, f_ref, wv_ref, wf_ref, w23_ref, b_ref, o_ref):
    # Layer 1 (preprocess Linears + first MLP Linear, algebraically folded):
    #   h = view @ (W1 @ W3a[:2E]) + feat @ (W2 @ W3a[2E:]) + fused_bias
    h = (jnp.dot(v_ref[...].astype(jnp.bfloat16), wv_ref[...],
                 preferred_element_type=jnp.float32)
         + jnp.dot(f_ref[...].astype(jnp.bfloat16), wf_ref[...],
                   preferred_element_type=jnp.float32)
         + b_ref[0:1, :])
    h = jnp.maximum(h, 0.0)                                    # ReLU (f32, VPU)

    half = w23_ref.shape[0] // 2                               # 64 (static, tile-aligned)

    # MLP layer 2
    h = (jnp.dot(h.astype(jnp.bfloat16), w23_ref[:half, :],
                 preferred_element_type=jnp.float32) + b_ref[1:2, :])
    h = jnp.maximum(h, 0.0)                                    # ReLU

    # MLP layer 3 (output; weight zero-padded to 64 lanes, crop at the store)
    full = (jnp.dot(h.astype(jnp.bfloat16), w23_ref[half:, :],
                    preferred_element_type=jnp.float32) + b_ref[2:3, :])
    o_ref[...] = full[:, :o_ref.shape[-1]]


def prepare_params(params, embedded_size=EMBEDDED_SIZE):
    """One-time parameter preparation (NOT on the per-call path).

    Folds the preprocess Linears into MLP layer 1, casts weights to bf16, and
    packs the remaining weights / biases into few DMA-friendly operands.
    """
    two_e = 2 * embedded_size
    four_e = 4 * embedded_size

    w1, b1 = params["w1"], params["b1"]
    w2, b2 = params["w2"], params["b2"]
    w3a, b3a = params["w3a"], params["b3a"]
    w3b, b3b = params["w3b"], params["b3b"]
    w3c, b3c = params["w3c"], params["b3c"]

    w3a_v = w3a[:two_e, :]                                     # (2E, 4E)
    w3a_f = w3a[two_e:, :]                                     # (2E, 4E)

    # Algebraic fold of the two preprocess Linears into MLP layer 1 (f32 math,
    # then a single cast to bf16).
    wv_fused = (w1 @ w3a_v).astype(jnp.bfloat16)               # (Dv, 4E)
    wf_fused = (w2 @ w3a_f).astype(jnp.bfloat16)               # (Df, 4E)
    b_fused = b1 @ w3a_v + b2 @ w3a_f + b3a                    # (1, 4E) f32

    # Pack layer-2 / layer-3 weights into one sublane-aligned bf16 slab.
    # Rows [0:64] = W3b, rows [64:128] = W3c zero-padded to 64 output lanes.
    w3c_pad = jnp.zeros((four_e, four_e), jnp.float32).at[:, :embedded_size].set(w3c)
    w23 = jnp.concatenate([w3b, w3c_pad], axis=0).astype(jnp.bfloat16)  # (2*4E, 4E)

    # Pack the three biases into one small f32 array (row 2 zero-padded).
    b_all = jnp.zeros((3, four_e), jnp.float32)
    b_all = b_all.at[0:1, :].set(b_fused)
    b_all = b_all.at[1:2, :].set(b3b)
    b_all = b_all.at[2:3, :embedded_size].set(b3c)

    return dict(wv=wv_fused, wf=wf_fused, w23=w23, b_all=b_all)


def private_source_encoder(view, feature, prepared, embedded_size=EMBEDDED_SIZE):
    """Forward pass of Private_source_encoder using prepared (fused/packed) params.

    view:     (B, *view_space)    -> flattened to (B, Dv)
    feature:  (B, *feature_space) -> flattened to (B, Df)
    prepared: output of prepare_params(params)
    returns:  (B, embedded_size) float32
    """
    B = view.shape[0]
    v_flat = view.reshape(B, -1).astype(jnp.float32)
    f_flat = feature.reshape(B, -1).astype(jnp.float32)
    dv = v_flat.shape[1]
    df = f_flat.shape[1]
    hidden = 4 * embedded_size

    # Advisory cost hint so XLA can schedule/overlap this tiny custom call.
    flops = 2 * B * (dv * hidden + df * hidden + hidden * hidden + hidden * hidden)
    bytes_accessed = int(
        v_flat.size * 4 + f_flat.size * 4
        + prepared["wv"].size * 2 + prepared["wf"].size * 2
        + prepared["w23"].size * 2 + prepared["b_all"].size * 4
        + B * embedded_size * 4)

    vmem = pl.BlockSpec(memory_space=pltpu.MemorySpace.VMEM)
    inputs = (v_flat, f_flat,
              prepared["wv"], prepared["wf"],
              prepared["w23"], prepared["b_all"])

    out = pl.pallas_call(
        _encoder_kernel,
        out_shape=jax.ShapeDtypeStruct((B, embedded_size), jnp.float32),
        in_specs=[vmem] * len(inputs),
        out_specs=vmem,
        cost_estimate=pl.CostEstimate(flops=flops, transcendentals=0,
                                      bytes_accessed=bytes_accessed),
        # no grid: single invocation; at B=2 per-step pipeline overhead is pure loss.
        # TODO(synk): if B grows past a few hundred, add a B-grid with
        # dimension_semantics=("parallel",) and constant index_maps for weights.
    )(*inputs)
    return out


def _encoder_ref(view, feature, params):
    """Pure-JAX f32 reference mirroring the PyTorch module literally."""
    B = view.shape[0]
    v = view.reshape(B, -1).astype(jnp.float32) @ params["w1"] + params["b1"]
    f = feature.reshape(B, -1).astype(jnp.float32) @ params["w2"] + params["b2"]
    h = jnp.concatenate([v, f], axis=1)
    h = jax.nn.relu(h @ params["w3a"] + params["b3a"])
    h = jax.nn.relu(h @ params["w3b"] + params["b3b"])
    return h @ params["w3c"] + params["b3c"]


def _init_params(key, dv, df, embedded_size):
    two_e = 2 * embedded_size
    four_e = 4 * embedded_size
    ks = jax.random.split(key, 10)

    def lin(kw, kb, din, dout):
        w = jax.random.normal(kw, (din, dout), jnp.float32) * (1.0 / jnp.sqrt(din))
        b = jax.random.normal(kb, (1, dout), jnp.float32) * 0.01
        return w, b

    w1, b1 = lin(ks[0], ks[1], dv, two_e)
    w2, b2 = lin(ks[2], ks[3], df, two_e)
    w3a, b3a = lin(ks[4], ks[5], four_e, four_e)
    w3b, b3b = lin(ks[6], ks[7], four_e, four_e)
    w3c, b3c = lin(ks[8], ks[9], four_e, embedded_size)
    return dict(w1=w1, b1=b1, w2=w2, b2=b2,
                w3a=w3a, b3a=b3a, w3b=w3b, b3b=b3b, w3c=w3c, b3c=b3c)


if __name__ == "__main__":
    key = jax.random.PRNGKey(0)
    k_view, k_feat, k_par = jax.random.split(key, 3)

    # shapes consistent with the module:
    #   view_space = (4, 16, 16) -> Dv = 1024, feature_space = (32,) -> Df = 32
    B = 2
    view = jax.random.normal(k_view, (B, 4, 16, 16), dtype=jnp.float32)
    feature = jax.random.normal(k_feat, (B, 32), dtype=jnp.float32)

    dv = 4 * 16 * 16
    df = 32
    params = _init_params(k_par, dv, df, EMBEDDED_SIZE)
    prepared = prepare_params(params)          # one-time parameter preparation

    out = private_source_encoder(view, feature, prepared)
    out = jax.block_until_ready(out)

    ref = _encoder_ref(view, feature, params)  # f32 reference on original layout
    assert out.shape == (B, EMBEDDED_SIZE), out.shape
    # bf16 weights vs f32 reference -> loosened tolerance (per perf review)
    assert jnp.allclose(out, ref, atol=5e-2, rtol=5e-2), float(
        jnp.max(jnp.abs(out - ref)))
    print("KERNEL_OK")
</pallas_src>

<mosaic_0001>
module attributes {stable_mosaic.version = 11 : i64} {
  func.func @_encoder_kernel(%arg0: memref<2x1024xf32, #tpu.memory_space<vmem>>, %arg1: memref<2x32xf32, #tpu.memory_space<vmem>>, %arg2: memref<1024x64xbf16, #tpu.memory_space<vmem>>, %arg3: memref<32x64xbf16, #tpu.memory_space<vmem>>, %arg4: memref<128x64xbf16, #tpu.memory_space<vmem>>, %arg5: memref<3x64xf32, #tpu.memory_space<vmem>>, %arg6: memref<2x16xf32, #tpu.memory_space<vmem>>) attributes {dimension_semantics = [], scalar_prefetch = 0 : i64, scratch_operands = 0 : i64, tpu.core_type = #tpu.core_type<tc>} {
    %c0 = arith.constant 0 : index
    %c0_0 = arith.constant 0 : index
    %0 = vector.load %arg0[%c0, %c0_0] : memref<2x1024xf32, #tpu.memory_space<vmem>>, vector<2x1024xf32>
    %1 = arith.truncf %0 : vector<2x1024xf32> to vector<2x1024xbf16>
    %c0_1 = arith.constant 0 : index
    %c0_2 = arith.constant 0 : index
    %2 = vector.load %arg2[%c0_1, %c0_2] : memref<1024x64xbf16, #tpu.memory_space<vmem>>, vector<1024x64xbf16>
    %cst = arith.constant dense<0.000000e+00> : vector<2x64xf32>
    %3 = tpu.matmul %1, %2, %cst {dimension_numbers = #tpu.dot_dimension_numbers<[1], [0], [0], [1], [0, 0, 1, 1], [], []>} : vector<2x1024xbf16>, vector<1024x64xbf16>, vector<2x64xf32> -> vector<2x64xf32>
    %c0_3 = arith.constant 0 : index
    %c0_4 = arith.constant 0 : index
    %4 = vector.load %arg1[%c0_3, %c0_4] : memref<2x32xf32, #tpu.memory_space<vmem>>, vector<2x32xf32>
    %5 = arith.truncf %4 : vector<2x32xf32> to vector<2x32xbf16>
    %c0_5 = arith.constant 0 : index
    %c0_6 = arith.constant 0 : index
    %6 = vector.load %arg3[%c0_5, %c0_6] : memref<32x64xbf16, #tpu.memory_space<vmem>>, vector<32x64xbf16>
    %cst_7 = arith.constant dense<0.000000e+00> : vector<2x64xf32>
    %7 = tpu.matmul %5, %6, %cst_7 {dimension_numbers = #tpu.dot_dimension_numbers<[1], [0], [0], [1], [0, 0, 1, 1], [], []>} : vector<2x32xbf16>, vector<32x64xbf16>, vector<2x64xf32> -> vector<2x64xf32>
    %8 = arith.addf %3, %7 : vector<2x64xf32>
    %c0_8 = arith.constant 0 : index
    %c0_9 = arith.constant 0 : index
    %9 = vector.load %arg5[%c0_8, %c0_9] : memref<3x64xf32, #tpu.memory_space<vmem>>, vector<1x64xf32>
    %10 = vector.broadcast %9 : vector<1x64xf32> to vector<2x64xf32>
    %11 = arith.addf %8, %10 : vector<2x64xf32>
    %cst_10 = arith.constant 0.000000e+00 : f32
    %12 = vector.broadcast %cst_10 : f32 to vector<2x64xf32>
    %13 = arith.maximumf %11, %12 : vector<2x64xf32>
    %14 = arith.truncf %13 : vector<2x64xf32> to vector<2x64xbf16>
    %c0_11 = arith.constant 0 : index
    %c0_12 = arith.constant 0 : index
    %15 = vector.load %arg4[%c0_11, %c0_12] : memref<128x64xbf16, #tpu.memory_space<vmem>>, vector<64x64xbf16>
    %cst_13 = arith.constant dense<0.000000e+00> : vector<2x64xf32>
    %16 = tpu.matmul %14, %15, %cst_13 {dimension_numbers = #tpu.dot_dimension_numbers<[1], [0], [0], [1], [0, 0, 1, 1], [], []>} : vector<2x64xbf16>, vector<64x64xbf16>, vector<2x64xf32> -> vector<2x64xf32>
    %c1 = arith.constant 1 : index
    %c0_14 = arith.constant 0 : index
    %17 = vector.load %arg5[%c1, %c0_14] : memref<3x64xf32, #tpu.memory_space<vmem>>, vector<1x64xf32>
    %18 = vector.broadcast %17 : vector<1x64xf32> to vector<2x64xf32>
    %19 = arith.addf %16, %18 : vector<2x64xf32>
    %cst_15 = arith.constant 0.000000e+00 : f32
    %20 = vector.broadcast %cst_15 : f32 to vector<2x64xf32>
    %21 = arith.maximumf %19, %20 : vector<2x64xf32>
    %22 = arith.truncf %21 : vector<2x64xf32> to vector<2x64xbf16>
    %c64 = arith.constant 64 : index
    %c0_16 = arith.constant 0 : index
    %23 = vector.load %arg4[%c64, %c0_16] : memref<128x64xbf16, #tpu.memory_space<vmem>>, vector<64x64xbf16>
    %cst_17 = arith.constant dense<0.000000e+00> : vector<2x64xf32>
    %24 = tpu.matmul %22, %23, %cst_17 {dimension_numbers = #tpu.dot_dimension_numbers<[1], [0], [0], [1], [0, 0, 1, 1], [], []>} : vector<2x64xbf16>, vector<64x64xbf16>, vector<2x64xf32> -> vector<2x64xf32>
    %c2 = arith.constant 2 : index
    %c0_18 = arith.constant 0 : index
    %25 = vector.load %arg5[%c2, %c0_18] : memref<3x64xf32, #tpu.memory_space<vmem>>, vector<1x64xf32>
    %26 = vector.broadcast %25 : vector<1x64xf32> to vector<2x64xf32>
    %27 = arith.addf %24, %26 : vector<2x64xf32>
    %28 = vector.extract_strided_slice %27 {offsets = [0, 0], sizes = [2, 16], strides = [1, 1]} : vector<2x64xf32> to vector<2x16xf32>
    %c0_19 = arith.constant 0 : index
    %c0_20 = arith.constant 0 : index
    %29 = vector.load %arg6[%c0_19, %c0_20] : memref<2x16xf32, #tpu.memory_space<vmem>>, vector<2x16xf32>
    tpu.vector_store %arg6[%c0_19, %c0_20], %28 {strides = array<i32>} : memref<2x16xf32, #tpu.memory_space<vmem>>, vector<2x16xf32>,
    return
  }
}

</mosaic_0001>

<bundles_post_ra>
// kernel: tpu_custom_call.1
= control target key start
LH: loop header
LB: loop body
LE: loop exit
PB: predicated region body
PF: predicated region fallthrough
CT: control target
= control target key end

     0   :  { %v1317_v1 = vmov 0.0   ;;  %vm1318_vm0 = vmmov 0   ;;  %vm225_vm1 = vcmask 261120   ;;  %v33_v30 = vlaneseq  ;;  %s1632_s0 = inlined_call_operand.vmem [shape: f32[2,1024], index: 0, kind: input, shape index: {}]   ;;  %s1633_s1 = inlined_call_operand.vmem [shape: f32[2,32], index: 1, kind: input, shape index: {}]   ;;  %s1634_s2 = inlined_call_operand.vmem [shape: bf16[1024,64], index: 2, kind: input, shape index: {}]   ;;  %s1635_s3 = inlined_call_operand.vmem [shape: bf16[32,64], index: 3, kind: input, shape index: {}]   ;;  %s1636_s4 = inlined_call_operand.vmem [shape: bf16[128,64], index: 4, kind: input, shape index: {}]   ;;  %s1637_s5 = inlined_call_operand.vmem [shape: f32[3,64], index: 5, kind: input, shape index: {}]   ;;  %s1638_s6 = inlined_call_operand.hbm [shape: f32[2,16], index: 6, kind: output, shape index: {}]  }
   0x1   :  { %v1217_v0 = vld [vmem:[%s1635_s3] sm:$0xff]   ;;  %1181 = vmatprep.subr.bf16.mxu0 %v1317_v1  ;;  %1185 = vmatprep.mubr.msk.bf16.mxu0 %vm1318_vm0, %v1317_v1  ;;  %v1220_v4 = vld [vmem:[%s1635_s3 + $0x8] sm:$0xff]   ;;  %v1224_v10 = vld [vmem:[%s1634_s2 + $0x50] sm:$0xff]   ;;  %v1319_v35 = vmov 1983009808  }
   0x2   :  { %v1218_v2 = vld [vmem:[%s1634_s2 + $0x40] sm:$0xff]   ;;  %1182 = vmatpush3.bf16.msra.mxu0 %v1217_v0  ;;  %v1221_v5 = vld [vmem:[%s1634_s2 + $0x48] sm:$0xff]   ;;  %v1226_v12 = vld [vmem:[%s1634_s2 + $0x10] sm:$0xff]   ;;  %v31_v36 = vunpack.c.l.s4 %v1319_v35  ;;  %v34_v37 = vshrl.u32 %v33_v30, 7 }
   0x3   :  { %v1219_v3 = vld [vmem:[%s1634_s2] sm:$0xff]   ;;  %1083 = vmatprep.subr.bf16.mxu1 %v1218_v2  ;;  %1183 = vmatprep.subr.bf16.mxu0 %v1317_v1  ;;  %v1222_v6 = vld [vmem:[%s1634_s2 + $0x8] sm:$0xff]   ;;  %v1228_v14 = vld [vmem:[%s1634_s2 + $0x58] sm:$0xff]  }
   0x4   :  { %1084 = vmatpush3.bf16.msra.mxu1 %v1219_v3  ;;  %v207_v7 = vld [vmem:[%s1633_s1] sm:$0x3]  ;;  %v1227_v13 = vld [vmem:[%s1634_s2 + $0xc8] sm:$0xff]   ;;  %v1230_v16 = vld [vmem:[%s1634_s2 + $0x18] sm:$0xff]   ;;  %v32_v41 = vunpack.c.0.s8 %v31_v36 }
   0x5   :  { %1085 = vmatprep.subr.bf16.mxu1 %v1221_v5  ;;  %v208_v8 = vpack.c.bf16 %v207_v7, %v207_v7  ;;  %v1223_v9 = vld [vmem:[%s1634_s2 + $0xc0] sm:$0xff]   ;;  %v1229_v15 = vld [vmem:[%s1634_s2 + $0x88] sm:$0xff]   ;;  %v1231_v17 = vld [vmem:[%s1634_s2 + $0xd0] sm:$0xff]  }
   0x6   :  { %1184 = vmatpush3.bf16.msra.mxu0 %v1220_v4  ;;  %v1225_v11 = vld [vmem:[%s1634_s2 + $0x80] sm:$0xff]   ;;  %v1233_v19 = vld [vmem:[%s1634_s2 + $0x90] sm:$0xff]   ;;  %v1235_v21 = vld [vmem:[%s1634_s2 + $0xd8] sm:$0xff]   ;;  %v1465_v43 = vsub.s32 %v32_v41, %v34_v37 }
   0x7   :  { %1105 = vmatprep.subr.bf16.mxu0 %v1223_v9  ;;  %v1232_v18 = vld [vmem:[%s1634_s2 + $0x60] sm:$0xff]   ;;  %v1236_v22 = vld [vmem:[%s1634_s2 + $0x68] sm:$0xff]   ;;  %v1237_v23 = vld [vmem:[%s1634_s2 + $0x98] sm:$0xff]  }
   0x8   :  { %1086 = vmatpush3.bf16.msra.mxu1 %v1222_v6  ;;  %v1234_v20 = vld [vmem:[%s1634_s2 + $0x20] sm:$0xff]   ;;  %v1238_v24 = vld [vmem:[%s1634_s2 + $0x28] sm:$0xff]   ;;  %v1240_v26 = vld [vmem:[%s1634_s2 + $0x70] sm:$0xff]  }
   0x9   :  { %1186 = vmatmul.mubr.msk.bf16.vlgmr.msra.gmra.mrb[0].mxu0 %vm225_vm1, %v208_v8  ;;  %1087 = vmatprep.subr.bf16.mxu1 %v1224_v10  ;;  %v1239_v25 = vld [vmem:[%s1634_s2 + $0xe0] sm:$0xff]   ;;  %v1242_v28 = vld [vmem:[%s1634_s2 + $0x30] sm:$0xff]   ;;  %v1243_v29 = vld [vmem:[%s1634_s2 + $0xe8] sm:$0xff]  }
   0xa   :  { %1106 = vmatpush3.bf16.msra.mxu0 %v1225_v11  ;;  %v1241_v27 = vld [vmem:[%s1634_s2 + $0xa0] sm:$0xff]   ;;  %v1244_v31 = vld [vmem:[%s1634_s2 + $0x78] sm:$0xff]   ;;  %v1245_v32 = vld [vmem:[%s1634_s2 + $0xa8] sm:$0xff]  }
   0xb   :  { %1107 = vmatprep.subr.bf16.mxu0 %v1227_v13  ;;  %v1246_v33 = vld [vmem:[%s1634_s2 + $0x38] sm:$0xff]   ;;  %v25_v34 = vld [vmem:[%s1632_s0] sm:$0xff]  ;;  %v1248_v38 = vld [vmem:[%s1634_s2 + $0xf0] sm:$0xff]  }
   0xc   :  { %1088 = vmatpush3.bf16.msra.mxu1 %v1226_v12  ;;  %v1249_v39 = vld [vmem:[%s1634_s2 + $0xb0] sm:$0xff]   ;;  %v29_v40 = vcombine.high %v25_v34, %v25_v34  ;;  %v1250_v42 = vld [vmem:[%s1634_s2 + $0x140] sm:$0xff]   ;;  %v1252_v44 = vld [vmem:[%s1634_s2 + $0xf8] sm:$0xff]   ;;  %v36_v46 = vrot.slane %v25_v34, %v1465_v43 }
   0xd   :  { %1089 = vmatprep.subr.bf16.mxu1 %v1228_v14  ;;  %v1253_v45 = vld [vmem:[%s1634_s2 + $0xb8] sm:$0xff]   ;;  %v1256_v50 = vld [vmem:[%s1634_s2 + $0x1c0] sm:$0xff]   ;;  %v1254_v57 = vld [vmem:[%s1634_s2 + $0x148] sm:$0xff]  }
   0xe   :  { %1108 = vmatpush3.bf16.msra.mxu0 %v1229_v15  ;;  %v43_v47 = vrot.slane %v29_v40, %v1465_v43  ;;  %v44_v48 = vcombine.high %v36_v46, %v36_v46  ;;  %v71_v51 = vpack.c.bf16 %v36_v46, %v36_v46  ;;  %v1251_v52 = vld [vmem:[%s1634_s2 + $0x100] sm:$0xff]   ;;  %v1260_v58 = vld [vmem:[%s1634_s2 + $0x1c8] sm:$0xff]   ;;  %v1257_v61 = vld [vmem:[%s1634_s2 + $0x150] sm:$0xff]  }
   0xf   :  { %1109 = vmatprep.subr.bf16.mxu0 %v1231_v17  ;;  %v1258_v56 = vld [vmem:[%s1634_s2 + $0x180] sm:$0xff]   ;;  %v1255_v59 = vld [vmem:[%s1634_s2 + $0x108] sm:$0xff]   ;;  %v1264_v62 = vld [vmem:[%s1634_s2 + $0x1d0] sm:$0xff]  }
  0x10   :  { %1090 = vmatpush3.bf16.msra.mxu1 %v1230_v16  ;;  %v45_v49 = vcombine.high %v43_v47, %v43_v47  ;;  %v73_v53 = vpack.c.bf16 %v43_v47, %v43_v47  ;;  %v72_v54 = vpack.c.bf16 %v44_v48, %v44_v48  ;;  %v1262_v60 = vld [vmem:[%s1634_s2 + $0x188] sm:$0xff]   ;;  %v1259_v63 = vld [vmem:[%s1634_s2 + $0x110] sm:$0xff]   ;;  %v1261_v2 = vld [vmem:[%s1634_s2 + $0x158] sm:$0xff]  }
  0x11   :  { %1091 = vmatprep.subr.bf16.mxu1 %v1232_v18  ;;  %v1266_v0 = vld [vmem:[%s1634_s2 + $0x190] sm:$0xff]   ;;  %v1268_v3 = vld [vmem:[%s1634_s2 + $0x1d8] sm:$0xff]   ;;  %v1265_v6 = vld [vmem:[%s1634_s2 + $0x160] sm:$0xff]  }
  0x12   :  { %1110 = vmatpush3.bf16.msra.mxu0 %v1233_v19  ;;  %v74_v55 = vpack.c.bf16 %v45_v49, %v45_v49  ;;  %685 = vmatprep.mubr.bf16.mxu1 %v72_v54  ;;  %v1263_v4 = vld [vmem:[%s1634_s2 + $0x118] sm:$0xff]   ;;  %v1272_v7 = vld [vmem:[%s1634_s2 + $0x1e0] sm:$0xff]   ;;  %v1269_v10 = vld [vmem:[%s1634_s2 + $0x168] sm:$0xff]  }
  0x13   :  { %1111 = vmatprep.subr.bf16.mxu0 %v1235_v21  ;;  %v1270_v5 = vld [vmem:[%s1634_s2 + $0x198] sm:$0xff]   ;;  %v1267_v8 = vld [vmem:[%s1634_s2 + $0x120] sm:$0xff]   ;;  %v1276_v11 = vld [vmem:[%s1634_s2 + $0x1e8] sm:$0xff]  }
  0x14   :  { %1092 = vmatpush3.bf16.msra.mxu1 %v1234_v20  ;;  %725 = vmatprep.mubr.bf16.mxu0 %v74_v55  ;;  %v1274_v9 = vld [vmem:[%s1634_s2 + $0x1a0] sm:$0xff]   ;;  %v1271_v12 = vld [vmem:[%s1634_s2 + $0x128] sm:$0xff]   ;;  %v1273_v14 = vld [vmem:[%s1634_s2 + $0x170] sm:$0xff]  }
  0x15   :  { %1093 = vmatprep.subr.bf16.mxu1 %v1236_v22  ;;  %v1278_v13 = vld [vmem:[%s1634_s2 + $0x1a8] sm:$0xff]   ;;  %v1275_v16 = vld [vmem:[%s1634_s2 + $0x130] sm:$0xff]   ;;  %v1277_v20 = vld [vmem:[%s1634_s2 + $0x178] sm:$0xff]  }
  0x16   :  { %1112 = vmatpush3.bf16.msra.mxu0 %v1237_v23  ;;  %v26_v15 = vld [vmem:[%s1632_s0 + $0x8] sm:$0xff]  ;;  %v1280_v18 = vld [vmem:[%s1634_s2 + $0x1f0] sm:$0xff]  }
  0x17   :  { %1113 = vmatprep.subr.bf16.mxu0 %v1239_v25  ;;  %v53_v17 = vrot.slane %v26_v15, %v1465_v43  ;;  %v46_v19 = vcombine.high %v26_v15, %v26_v15  ;;  %v1281_v22 = vld [vmem:[%s1634_s2 + $0x1b0] sm:$0xff]   ;;  %v1279_v25 = vld [vmem:[%s1634_s2 + $0x138] sm:$0xff]  }
  0x18   :  { %1094 = vmatpush3.bf16.msra.mxu1 %v1238_v24  ;;  %v1282_v24 = vld [vmem:[%s1634_s2 + $0x1f8] sm:$0xff]  }
  0x19   :  { %1095 = vmatprep.subr.bf16.mxu1 %v1240_v26  ;;  %v61_v21 = vcombine.high %v53_v17, %v53_v17  ;;  %v60_v23 = vrot.slane %v46_v19, %v1465_v43  ;;  %v75_v30 = vpack.c.bf16 %v53_v17, %v53_v17 }
  0x1a   :  { %1114 = vmatpush3.bf16.msra.mxu0 %v1241_v27 }
  0x1b   :  { %1115 = vmatprep.subr.bf16.mxu0 %v1243_v29  ;;  %v76_v26 = vpack.c.bf16 %v61_v21, %v61_v21  ;;  %v62_v27 = vcombine.high %v60_v23, %v60_v23 }
  0x1c   :  { %1096 = vmatpush3.bf16.msra.mxu1 %v1242_v28  ;;  %v1283_v28 = vld [vmem:[%s1634_s2 + $0x1b8] sm:$0xff]  }
  0x1d   :  { %1097 = vmatprep.subr.bf16.mxu1 %v1244_v31  ;;  %v78_v29 = vpack.c.bf16 %v62_v27, %v62_v27 }
  0x1e   :  { %1116 = vmatpush3.bf16.msra.mxu0 %v1245_v32 }
  0x1f   :  { %1117 = vmatprep.subr.bf16.mxu0 %v1248_v38 }
  0x20   :  { %1098 = vmatpush3.bf16.msra.mxu1 %v1246_v33 }
  0x21   :  { %1127 = vmatprep.subr.bf16.mxu1 %v1250_v42 }
  0x22   :  { %1118 = vmatpush3.bf16.msra.mxu0 %v1249_v39 }
  0x23   :  { %1119 = vmatprep.subr.bf16.mxu0 %v1252_v44  ;;  %686 = vmatmul.mubr.bf16.vlgmr.msra.gmra.mrb[0].mxu1 %v71_v51 }
  0x24   :  { %1128 = vmatpush3.bf16.msra.mxu1 %v1251_v52  ;;  %765 = vmatprep.mubr.bf16.mxu1 %v76_v26 }
  0x25   :  { %1129 = vmatprep.subr.bf16.mxu1 %v1254_v57 }
  0x26   :  { %1120 = vmatpush3.bf16.msra.mxu0 %v1253_v45 }
  0x27   :  { %1149 = vmatprep.subr.bf16.mxu0 %v1256_v50 }
  0x28   :  { %1130 = vmatpush3.bf16.msra.mxu1 %v1255_v59 }
  0x29   :  { %726 = vmatmul.mubr.bf16.vlgmr.msra.gmra.mrb[4].mxu0 %v73_v53  ;;  %1131 = vmatprep.subr.bf16.mxu1 %v1257_v61 }
  0x2a   :  { %1150 = vmatpush3.bf16.msra.mxu0 %v1258_v56  ;;  %805 = vmatprep.mubr.bf16.mxu0 %v78_v29 }
  0x2b   :  { %1151 = vmatprep.subr.bf16.mxu0 %v1260_v58 }
  0x2c   :  { %1132 = vmatpush3.bf16.msra.mxu1 %v1259_v63 }
  0x2d   :  { %1133 = vmatprep.subr.bf16.mxu1 %v1261_v2 }
  0x2e   :  { %1152 = vmatpush3.bf16.msra.mxu0 %v1262_v60 }
  0x2f   :  { %1153 = vmatprep.subr.bf16.mxu0 %v1264_v62 }
  0x30   :  { %1134 = vmatpush3.bf16.msra.mxu1 %v1263_v4 }
  0x31   :  { %1135 = vmatprep.subr.bf16.mxu1 %v1265_v6 }
  0x32   :  { %1154 = vmatpush3.bf16.msra.mxu0 %v1266_v0 }
  0x33   :  { %1155 = vmatprep.subr.bf16.mxu0 %v1268_v3 }
  0x34   :  { %1136 = vmatpush3.bf16.msra.mxu1 %v1267_v8 }
  0x35   :  { %1137 = vmatprep.subr.bf16.mxu1 %v1269_v10 }
  0x36   :  { %1156 = vmatpush3.bf16.msra.mxu0 %v1270_v5 }
  0x37   :  { %1157 = vmatprep.subr.bf16.mxu0 %v1272_v7 }
  0x38   :  { %1138 = vmatpush3.bf16.msra.mxu1 %v1271_v12 }
  0x39   :  { %1139 = vmatprep.subr.bf16.mxu1 %v1273_v14 }
  0x3a   :  { %1158 = vmatpush3.bf16.msra.mxu0 %v1274_v9 }
  0x3b   :  { %1159 = vmatprep.subr.bf16.mxu0 %v1276_v11 }
  0x3c   :  { %1140 = vmatpush3.bf16.msra.mxu1 %v1275_v16 }
  0x3d   :  { %1141 = vmatprep.subr.bf16.mxu1 %v1277_v20 }
  0x3e   :  { %1160 = vmatpush3.bf16.msra.mxu0 %v1278_v13 }
  0x3f   :  { %1161 = vmatprep.subr.bf16.mxu0 %v1280_v18 }
  0x42   :  { %1162 = vmatpush3.bf16.msra.mxu0 %v1281_v22 }
  0x43   :  { %1163 = vmatprep.subr.bf16.mxu0 %v1282_v24 }
  0x44   :  { %11 = vsyncpa [#allocation3], 0  ;;  %1142 = vmatpush3.bf16.msra.mxu1 %v1279_v25  ;;  %v77_v31 = vpack.c.bf16 %v60_v23, %v60_v23  ;;  %v1285_v32 = vld [vmem:[%s1636_s4] sm:$0xff]   ;;  %v1286_v33 = vld [vmem:[%s1636_s4 + $0x8] sm:$0xff]   ;;  %vm858_vm2 = vcmask 523264   ;;  %vm984_vm3 = vcmask 123904  }
  0x45   :  { %1189 = vmatprep.subr.bf16.mxu1 %v1317_v1  ;;  %v1287_v34 = vld [vmem:[%s1636_s4 + $0x10] sm:$0xff]   ;;  %v1288_v35 = vld [vmem:[%s1636_s4 + $0x18] sm:$0xff]   ;;  %v1289_v36 = vld [vmem:[%s1636_s4 + $0x20] sm:$0xff]  }
  0x46   :  { %1164 = vmatpush3.bf16.msra.mxu0 %v1283_v28  ;;  %v1290_v37 = vld [vmem:[%s1636_s4 + $0x28] sm:$0xff]   ;;  %v1067_v2 = vld [vmem:[%s1637_s5] ss:$0 sm:$0xff]  ;;  %v1291_v7 = vld [vmem:[%s1636_s4 + $0x30] sm:$0xff]  }
  0x47   :  { %1201 = vmatprep.subr.bf16.mxu0 %v1317_v1  ;;  %766 = vmatmul.mubr.bf16.vlgmr.msra.gmra.mrb[4].mxu1 %v75_v30  ;;  %v1292_v8 = vld [vmem:[%s1636_s4 + $0x38] sm:$0xff]   ;;  %v1068_v9 = vld [vmem:[%s1637_s5 + $0x1] ss:$0 sm:$0xff]  ;;  %v1074_v17 = vld [vmem:[%s1637_s5 + $0x2] ss:$0 sm:$0xff]  ;;  %s1320_s4 = smov [#allocation2]  }
  0x48   :  { %1197 = vmatprep.mubr.msk.bf16.mxu1 %vm1318_vm0, %v1317_v1  ;;  %1190 = vmatpush3.bf16.msra.mxu1 %v1285_v32  ;;  %s992_s22 = sshll.u32 %s1320_s4, 4  ;;  %s993_s22 = int_to_ptr.vmem [resolvable:$true] %s992_s22 }
  0x49   :  { %806 = vmatmul.mubr.bf16.vlgmr.msra.gmra.mrb[8].mxu0 %v77_v31  ;;  %1191 = vmatprep.subr.bf16.mxu1 %v1317_v1  ;;  %s1293_s23 = scalar_lea.vmem %s993_s22, 32  ;;  %p1298_p1 = scmp.lt.s32.totalorder %s993_s22, %s993_s22 }
  0x4a   :  { %1209 = vmatprep.mubr.msk.bf16.mxu0 %vm1318_vm0, %v1317_v1  ;;  %1202 = vmatpush3.bf16.msra.mxu0 %v1289_v36  ;;  %p1294_p0 = scmp.ne.s32.totalorder %s993_s22, %s1293_s23  ;;  %p1299_p2 = scmp.lt.s32.totalorder %s1293_s23, %s1293_s23 }
  0x4b   :  { %1203 = vmatprep.subr.bf16.mxu0 %v1317_v1 }
  0x4c   :  { %1192 = vmatpush3.bf16.msra.mxu1 %v1286_v33  ;;  %p1300_p3 = por %p1299_p2, %p1298_p1 }
  0x4d   :  { %1193 = vmatprep.subr.bf16.mxu1 %v1317_v1 }
  0x4e   :  { %1204 = vmatpush3.bf16.msra.mxu0 %v1290_v37  ;;  %p1301_p4 = pnand %p1300_p3, %p1294_p0 }
  0x4f   :  { %1205 = vmatprep.subr.bf16.mxu0 %v1317_v1 }
  0x50   :  { %1194 = vmatpush3.bf16.msra.mxu1 %v1287_v34 }
  0x51   :  { %1195 = vmatprep.subr.bf16.mxu1 %v1317_v1 }
  0x52   :  { %1206 = vmatpush3.bf16.msra.mxu0 %v1291_v7 }
  0x53   :  { %1207 = vmatprep.subr.bf16.mxu0 %v1317_v1 }
  0x54   :  { %1196 = vmatpush3.bf16.msra.mxu1 %v1288_v35 }
  0x56   :  { %1208 = vmatpush3.bf16.msra.mxu0 %v1292_v8 }
  0xdc   :  { %v263_v38 = vpop.f32.mrb[0].mxu0 }
  0xdd   :  { %v1187_v39 = vpop.f32.mrb[1].mxu0 }
  0xde   :  { %v266_v40 = vpop.f32.mrb[2].mxu0 }
  0xdf   :  { %v1188_v41 = vpop.f32.mrb[3].mxu0 }
  0xf6   :  { %v1099_v42 = vpop.f32.mrb[0].mxu1 }
  0xf7   :  { %v1100_v44 = vpop.f32.mrb[1].mxu1 }
  0xf8   :  { %v1101_v46 = vadd.f32 %v1100_v44, %v1099_v42  ;;  %v1102_v47 = vpop.f32.mrb[2].mxu1 }
  0xf9   :  { %v1103_v50 = vpop.f32.mrb[3].mxu1 }
  0xfa   :  { %v688_v52 = vadd.f32 %v1101_v46, %v263_v38 }
  0xfc   :  { %v1121_v43 = vpop.f32.mrb[4].mxu0 }
  0xfd   :  { %v1122_v45 = vpop.f32.mrb[5].mxu0 }
  0xfe   :  { %v1123_v48 = vadd.f32 %v1122_v45, %v1121_v43  ;;  %v1124_v49 = vpop.f32.mrb[6].mxu0 }
  0xff   :  { %v1125_v51 = vpop.f32.mrb[7].mxu0 }
 0x100   :  { %v728_v53 = vadd.f32 %v1123_v48, %v688_v52 }
 0x11a   :  { %v1143_v54 = vpop.f32.mrb[4].mxu1 }
 0x11b   :  { %v1144_v55 = vpop.f32.mrb[5].mxu1 }
 0x11c   :  { %v1165_v56 = vpop.f32.mrb[8].mxu0  ;;  %v1145_v57 = vadd.f32 %v1144_v55, %v1143_v54  ;;  %v1146_v58 = vpop.f32.mrb[6].mxu1 }
 0x11d   :  { %v1166_v59 = vpop.f32.mrb[9].mxu0  ;;  %v1147_v60 = vpop.f32.mrb[7].mxu1 }
 0x11e   :  { %v1167_v61 = vadd.f32 %v1166_v59, %v1165_v56  ;;  %v1168_v62 = vpop.f32.mrb[10].mxu0  ;;  %v768_v63 = vadd.f32 %v1145_v57, %v728_v53 }
 0x11f   :  { %v1169_v0 = vpop.f32.mrb[11].mxu0 }
 0x120   :  { %v808_v3 = vadd.f32 %v1167_v61, %v768_v63 }
 0x122   :  { %v818_v4 = vadd.f32 %v1067_v2, %v808_v3 }
 0x124   :  { %v819_v5 = vmax.f32 %v818_v4, 0.0 }
 0x126   :  { %v820_v6 = vpack.c.bf16 %v819_v5, %v819_v5 }
 0x128   :  { %1198 = vmatmul.mubr.msk.bf16.vlgmr.msra.gmra.mrb[8].mxu1 %vm858_vm2, %v820_v6 }
 0x1fb   :  { %v896_v10 = vpop.f32.mrb[8].mxu1 }
 0x1fc   :  { %v897_v11 = vadd.f32 %v1068_v9, %v896_v10  ;;  %v1199_v12 = vpop.f32.mrb[9].mxu1 }
 0x1fd   :  { %v899_v13 = vpop.f32.mrb[10].mxu1 }
 0x1fe   :  { %v902_v14 = vmax.f32 %v897_v11, 0.0  ;;  %v1200_v15 = vpop.f32.mrb[11].mxu1 }
 0x200   :  { %v903_v16 = vpack.c.bf16 %v902_v14, %v902_v14 }
 0x202   :  { %1210 = vmatmul.mubr.msk.bf16.vlgmr.msra.gmra.mrb[12].mxu0 %vm858_vm2, %v903_v16 }
 0x2d5   :  { %v978_v1 = vpop.f32.mrb[12].mxu0 }
 0x2d6   :  { %v979_v18 = vadd.f32 %v1074_v17, %v978_v1  ;;  %v1211_v19 = vpop.f32.mrb[13].mxu0 }
 0x2d7   :  { %v981_v20 = vpop.f32.mrb[14].mxu0 }
 0x2d8   :  { %v1212_v21 = vpop.f32.mrb[15].mxu0  ;;  %985 = vst.msk [vmem:[#allocation2] sm:$0x3] %vm984_vm3, %v979_v18 }
 0x2d9   :  { %1304 = shalt.err (!%p1301_p4)
}
 0x2da   :  { %s1305_s5 = scalar_lea.hbm %s1638_s6, 32 }
 0x2db   :  { %p1306_p5 = scmp.ne.s32.totalorder %s1638_s6, %s1305_s5  ;;  %p1309_p6 = scmp.lt.u32.totalorder %s1305_s5, %s1638_s6 }
 0x2dd   :  { %p1311_p7 = pnand %p1309_p6, %p1306_p5 }
 0x2df   :  { %1314 = shalt.err (!%p1311_p7)
}
 0x2e0   :  { %995 = dma.vmem_to_hbm [thread:$0]  %s993_s22, 32, %s1638_s6, [#allocation3]  }
 0x2e1   :  { %1315 = dma.done.wait [#allocation3], 32  }
 0x2e2   :  { %1316 = vsyncadd [#allocation3], 4294967264 }
 0x2e3   :  { %999 = vsyncpa [#allocation3], 1 }

</bundles_post_ra>
